<compile_context>
chip_gen: v7x
topology: tpu7x:2x2x1
jax: 0.10.0
libtpu: 0.0.40
codegen_flags: <defaults>
</compile_context>

<pallas_src>
import functools

import jax
import jax.numpy as jnp
import numpy as np
from jax.experimental import pallas as pl
from jax.experimental.pallas import tpu as pltpu

# Flattened group table derived from the module's index arrays:
# (true_start, true_end, pred_start, pred_end, incomplete_col or None)
_GROUPS = (
    (0, 3, 0, 3, 3),
    (4, 8, 3, 7, 8),
    (9, 10, 7, 8, None),
    (10, 13, 8, 11, 13),
    (14, 18, 11, 15, 18),
    (19, 22, 15, 18, 22),
    (23, 27, 18, 22, 27),
    (28, 29, 22, 23, None),
)

_N_PRED = 23    # fine classes (y_pred width, also output width)
_N_TRUE = 29    # y_true width
_LANES = 128
_LOG_CLAMP = -100.0  # torch.nn.BCELoss clamps log() at -100


def _masked_bce_groups(y_pred_f32, y_true_f32):
    """Per-element masked BCE, concatenated over the 8 groups -> (rows, 23)."""
    pieces = []
    for ts, te, ps, pe, mc in _GROUPS:
        sub_t = y_true_f32[:, ts:te]
        sub_p = y_pred_f32[:, ps:pe]
        if mc is not None:
            m = 1.0 - y_true_f32[:, mc:mc + 1]
            # NOTE: the module masks BOTH the target and the prediction slice.
            sub_t = sub_t * m
            sub_p = sub_p * m
        log_p = jnp.maximum(jnp.log(sub_p), _LOG_CLAMP)
        log_1mp = jnp.maximum(jnp.log(1.0 - sub_p), _LOG_CLAMP)
        pieces.append(-(sub_t * log_p + (1.0 - sub_t) * log_1mp))
    return jnp.concatenate(pieces, axis=-1)


def _masked_loss_kernel(y_pred_ref, y_true_ref, out_ref, *, batch, tile):
    i = pl.program_id(0)
    yp = y_pred_ref[...].astype(jnp.float32)   # (tile, 23)
    yt = y_true_ref[...].astype(jnp.float32)   # (tile, 29)

    # Neutralize rows of the (possibly overhanging) last tile: forcing both
    # pred and true to 1.0 yields an exact-zero BCE contribution for every
    # group (masked groups see mask = 1 - 1 = 0).
    row_ids = i * tile + jax.lax.broadcasted_iota(jnp.int32, (tile, 1), 0)
    valid = row_ids < batch
    yp = jnp.where(valid, yp, 1.0)
    yt = jnp.where(valid, yt, 1.0)

    loss = _masked_bce_groups(yp, yt)                     # (tile, 23) f32
    partial = jnp.sum(loss, axis=0, keepdims=True)        # (1, 23)
    partial = jnp.concatenate(
        [partial, jnp.zeros((1, _LANES - _N_PRED), jnp.float32)], axis=-1
    )                                                     # (1, 128) lane-dense

    # Lane-dense (8, 128) partial-sum block: data in sublane 0, zeros below.
    sub_iota = jax.lax.broadcasted_iota(jnp.int32, (8, _LANES), 0)
    out_ref[...] = jnp.where(sub_iota == 0, partial, 0.0)


def masked_loss(y_pred, y_true, *, tile=8192):
    """DCASE fine-level masked loss. Returns a (23,) float32 vector."""
    batch = y_pred.shape[0]
    assert y_pred.shape == (batch, _N_PRED), y_pred.shape
    assert y_true.shape == (batch, _N_TRUE), y_true.shape

    # If the batch fits in one tile, use the full batch as the block (a block
    # equal to the full dim is always a legal sublane count); otherwise use
    # the (multiple-of-8) tile and mask the overhang of the last block.
    block_rows = batch if batch <= tile else tile
    num_tiles = pl.cdiv(batch, block_rows)

    kernel = functools.partial(_masked_loss_kernel, batch=batch, tile=block_rows)

    bytes_in = 4 * batch * (_N_PRED + _N_TRUE)
    cost = pl.CostEstimate(
        flops=10 * batch * _N_PRED,
        transcendentals=2 * batch * _N_PRED,
        bytes_accessed=bytes_in + num_tiles * 8 * _LANES * 4,
    )

    partials = pl.pallas_call(
        kernel,
        out_shape=jax.ShapeDtypeStruct((num_tiles * 8, _LANES), jnp.float32),
        grid=(num_tiles,),
        in_specs=[
            pl.BlockSpec((block_rows, _N_PRED), lambda i: (i, 0)),
            pl.BlockSpec((block_rows, _N_TRUE), lambda i: (i, 0)),
        ],
        out_specs=pl.BlockSpec((8, _LANES), lambda i: (i, 0)),
        compiler_params=pltpu.CompilerParams(
            dimension_semantics=("parallel",),
        ),
        cost_estimate=cost,
    )(y_pred, y_true)

    # Tiny epilogue: sum the per-tile partials and keep the 23 real classes.
    return jnp.sum(partials, axis=0)[:_N_PRED]


def masked_loss_ref(y_pred, y_true):
    """Pure-JAX reference mirroring the PyTorch module (BCE reduction='none')."""
    loss = _masked_bce_groups(y_pred.astype(jnp.float32),
                              y_true.astype(jnp.float32))
    return jnp.sum(loss, axis=0)


if __name__ == "__main__":
    key = jax.random.PRNGKey(0)
    k1, k2, k3, k4 = jax.random.split(key, 4)

    # Case 1: shapes from the module spec (batch=2, binary preds/targets).
    y_pred_a = jax.random.randint(k1, (2, _N_PRED), 0, 2).astype(jnp.float32)
    y_true_a = jax.random.randint(k2, (2, _N_TRUE), 0, 2).astype(jnp.float32)
    out_a = jax.block_until_ready(masked_loss(y_pred_a, y_true_a))
    ref_a = jax.block_until_ready(masked_loss_ref(y_pred_a, y_true_a))
    np.testing.assert_allclose(np.asarray(out_a), np.asarray(ref_a),
                               rtol=1e-5, atol=1e-5)

    # Case 2: small multi-tile case (grid of 3, overhanging last tile).
    y_pred_b = jax.random.uniform(k3, (20, _N_PRED), dtype=jnp.float32,
                                  minval=0.01, maxval=0.99)
    y_true_b = (jax.random.uniform(k4, (20, _N_TRUE)) > 0.5).astype(jnp.float32)
    out_b = jax.block_until_ready(masked_loss(y_pred_b, y_true_b, tile=8))
    ref_b = jax.block_until_ready(masked_loss_ref(y_pred_b, y_true_b))
    np.testing.assert_allclose(np.asarray(out_b), np.asarray(ref_b),
                               rtol=1e-5, atol=1e-5)

    print("KERNEL_OK")
</pallas_src>

<mosaic_0001>
module attributes {stable_mosaic.version = 11 : i64} {
  func.func @_masked_loss_kernel(%arg0: i32, %arg1: memref<2x23xf32, #tpu.memory_space<vmem>>, %arg2: memref<2x29xf32, #tpu.memory_space<vmem>>, %arg3: memref<8x128xf32, #tpu.memory_space<vmem>>) attributes {dimension_semantics = [#tpu.dimension_semantics<parallel>], iteration_bounds = array<i64: 1>, scalar_prefetch = 0 : i64, scratch_operands = 0 : i64, tpu.core_type = #tpu.core_type<tc>, window_params = [{transform_indices = @transform_0, window_bounds = array<i64: 2, 23>}, {transform_indices = @transform_1, window_bounds = array<i64: 2, 29>}, {transform_indices = @transform_2, window_bounds = array<i64: 8, 128>}]} {
    %c0 = arith.constant 0 : index
    %c0_0 = arith.constant 0 : index
    %0 = vector.load %arg1[%c0, %c0_0] : memref<2x23xf32, #tpu.memory_space<vmem>>, vector<2x23xf32>
    %c0_1 = arith.constant 0 : index
    %c0_2 = arith.constant 0 : index
    %1 = vector.load %arg2[%c0_1, %c0_2] : memref<2x29xf32, #tpu.memory_space<vmem>>, vector<2x29xf32>
    %c2_i32 = arith.constant 2 : i32
    %2 = arith.muli %arg0, %c2_i32 : i32
    %3 = tpu.iota {dimensions = array<i32: 0>} : vector<2x1xi32>
    %4 = vector.broadcast %2 : i32 to vector<2x1xi32>
    %5 = arith.addi %4, %3 : vector<2x1xi32>
    %c2_i32_3 = arith.constant 2 : i32
    %6 = vector.broadcast %c2_i32_3 : i32 to vector<2x1xi32>
    %7 = arith.cmpi slt, %5, %6 : vector<2x1xi32>
    %cst = arith.constant 1.000000e+00 : f32
    %8 = vector.shape_cast %7 : vector<2x1xi1> to vector<2x1xi1>
    %9 = vector.broadcast %8 : vector<2x1xi1> to vector<2x23xi1>
    %10 = vector.broadcast %cst : f32 to vector<2x23xf32>
    %11 = arith.select %9, %0, %10 : vector<2x23xi1>, vector<2x23xf32>
    %cst_4 = arith.constant 1.000000e+00 : f32
    %12 = vector.shape_cast %7 : vector<2x1xi1> to vector<2x1xi1>
    %13 = vector.broadcast %12 : vector<2x1xi1> to vector<2x29xi1>
    %14 = vector.broadcast %cst_4 : f32 to vector<2x29xf32>
    %15 = arith.select %13, %1, %14 : vector<2x29xi1>, vector<2x29xf32>
    %16 = vector.extract_strided_slice %15 {offsets = [0, 0], sizes = [2, 3], strides = [1, 1]} : vector<2x29xf32> to vector<2x3xf32>
    %17 = vector.extract_strided_slice %11 {offsets = [0, 0], sizes = [2, 3], strides = [1, 1]} : vector<2x23xf32> to vector<2x3xf32>
    %18 = vector.extract_strided_slice %15 {offsets = [0, 3], sizes = [2, 1], strides = [1, 1]} : vector<2x29xf32> to vector<2x1xf32>
    %cst_5 = arith.constant 1.000000e+00 : f32
    %19 = vector.broadcast %cst_5 : f32 to vector<2x1xf32>
    %20 = arith.subf %19, %18 : vector<2x1xf32>
    %21 = vector.broadcast %20 : vector<2x1xf32> to vector<2x3xf32>
    %22 = arith.mulf %16, %21 : vector<2x3xf32>
    %23 = vector.broadcast %20 : vector<2x1xf32> to vector<2x3xf32>
    %24 = arith.mulf %17, %23 : vector<2x3xf32>
    %25 = math.log %24 : vector<2x3xf32>
    %cst_6 = arith.constant -1.000000e+02 : f32
    %26 = vector.broadcast %cst_6 : f32 to vector<2x3xf32>
    %27 = arith.maximumf %25, %26 : vector<2x3xf32>
    %cst_7 = arith.constant 1.000000e+00 : f32
    %28 = vector.broadcast %cst_7 : f32 to vector<2x3xf32>
    %29 = arith.subf %28, %24 : vector<2x3xf32>
    %30 = math.log %29 : vector<2x3xf32>
    %cst_8 = arith.constant -1.000000e+02 : f32
    %31 = vector.broadcast %cst_8 : f32 to vector<2x3xf32>
    %32 = arith.maximumf %30, %31 : vector<2x3xf32>
    %33 = arith.mulf %22, %27 : vector<2x3xf32>
    %cst_9 = arith.constant 1.000000e+00 : f32
    %34 = vector.broadcast %cst_9 : f32 to vector<2x3xf32>
    %35 = arith.subf %34, %22 : vector<2x3xf32>
    %36 = arith.mulf %35, %32 : vector<2x3xf32>
    %37 = arith.addf %33, %36 : vector<2x3xf32>
    %cst_10 = arith.constant 0.000000e+00 : f32
    %38 = vector.broadcast %cst_10 : f32 to vector<2x3xf32>
    %39 = arith.subf %38, %37 : vector<2x3xf32>
    %40 = vector.extract_strided_slice %15 {offsets = [0, 4], sizes = [2, 4], strides = [1, 1]} : vector<2x29xf32> to vector<2x4xf32>
    %41 = vector.extract_strided_slice %11 {offsets = [0, 3], sizes = [2, 4], strides = [1, 1]} : vector<2x23xf32> to vector<2x4xf32>
    %42 = vector.extract_strided_slice %15 {offsets = [0, 8], sizes = [2, 1], strides = [1, 1]} : vector<2x29xf32> to vector<2x1xf32>
    %cst_11 = arith.constant 1.000000e+00 : f32
    %43 = vector.broadcast %cst_11 : f32 to vector<2x1xf32>
    %44 = arith.subf %43, %42 : vector<2x1xf32>
    %45 = vector.broadcast %44 : vector<2x1xf32> to vector<2x4xf32>
    %46 = arith.mulf %40, %45 : vector<2x4xf32>
    %47 = vector.broadcast %44 : vector<2x1xf32> to vector<2x4xf32>
    %48 = arith.mulf %41, %47 : vector<2x4xf32>
    %49 = math.log %48 : vector<2x4xf32>
    %cst_12 = arith.constant -1.000000e+02 : f32
    %50 = vector.broadcast %cst_12 : f32 to vector<2x4xf32>
    %51 = arith.maximumf %49, %50 : vector<2x4xf32>
    %cst_13 = arith.constant 1.000000e+00 : f32
    %52 = vector.broadcast %cst_13 : f32 to vector<2x4xf32>
    %53 = arith.subf %52, %48 : vector<2x4xf32>
    %54 = math.log %53 : vector<2x4xf32>
    %cst_14 = arith.constant -1.000000e+02 : f32
    %55 = vector.broadcast %cst_14 : f32 to vector<2x4xf32>
    %56 = arith.maximumf %54, %55 : vector<2x4xf32>
    %57 = arith.mulf %46, %51 : vector<2x4xf32>
    %cst_15 = arith.constant 1.000000e+00 : f32
    %58 = vector.broadcast %cst_15 : f32 to vector<2x4xf32>
    %59 = arith.subf %58, %46 : vector<2x4xf32>
    %60 = arith.mulf %59, %56 : vector<2x4xf32>
    %61 = arith.addf %57, %60 : vector<2x4xf32>
    %cst_16 = arith.constant 0.000000e+00 : f32
    %62 = vector.broadcast %cst_16 : f32 to vector<2x4xf32>
    %63 = arith.subf %62, %61 : vector<2x4xf32>
    %64 = vector.extract_strided_slice %15 {offsets = [0, 9], sizes = [2, 1], strides = [1, 1]} : vector<2x29xf32> to vector<2x1xf32>
    %65 = vector.extract_strided_slice %11 {offsets = [0, 7], sizes = [2, 1], strides = [1, 1]} : vector<2x23xf32> to vector<2x1xf32>
    %66 = math.log %65 : vector<2x1xf32>
    %cst_17 = arith.constant -1.000000e+02 : f32
    %67 = vector.broadcast %cst_17 : f32 to vector<2x1xf32>
    %68 = arith.maximumf %66, %67 : vector<2x1xf32>
    %cst_18 = arith.constant 1.000000e+00 : f32
    %69 = vector.broadcast %cst_18 : f32 to vector<2x1xf32>
    %70 = arith.subf %69, %65 : vector<2x1xf32>
    %71 = math.log %70 : vector<2x1xf32>
    %cst_19 = arith.constant -1.000000e+02 : f32
    %72 = vector.broadcast %cst_19 : f32 to vector<2x1xf32>
    %73 = arith.maximumf %71, %72 : vector<2x1xf32>
    %74 = arith.mulf %64, %68 : vector<2x1xf32>
    %cst_20 = arith.constant 1.000000e+00 : f32
    %75 = vector.broadcast %cst_20 : f32 to vector<2x1xf32>
    %76 = arith.subf %75, %64 : vector<2x1xf32>
    %77 = arith.mulf %76, %73 : vector<2x1xf32>
    %78 = arith.addf %74, %77 : vector<2x1xf32>
    %cst_21 = arith.constant 0.000000e+00 : f32
    %79 = vector.broadcast %cst_21 : f32 to vector<2x1xf32>
    %80 = arith.subf %79, %78 : vector<2x1xf32>
    %81 = vector.extract_strided_slice %15 {offsets = [0, 10], sizes = [2, 3], strides = [1, 1]} : vector<2x29xf32> to vector<2x3xf32>
    %82 = vector.extract_strided_slice %11 {offsets = [0, 8], sizes = [2, 3], strides = [1, 1]} : vector<2x23xf32> to vector<2x3xf32>
    %83 = vector.extract_strided_slice %15 {offsets = [0, 13], sizes = [2, 1], strides = [1, 1]} : vector<2x29xf32> to vector<2x1xf32>
    %cst_22 = arith.constant 1.000000e+00 : f32
    %84 = vector.broadcast %cst_22 : f32 to vector<2x1xf32>
    %85 = arith.subf %84, %83 : vector<2x1xf32>
    %86 = vector.broadcast %85 : vector<2x1xf32> to vector<2x3xf32>
    %87 = arith.mulf %81, %86 : vector<2x3xf32>
    %88 = vector.broadcast %85 : vector<2x1xf32> to vector<2x3xf32>
    %89 = arith.mulf %82, %88 : vector<2x3xf32>
    %90 = math.log %89 : vector<2x3xf32>
    %cst_23 = arith.constant -1.000000e+02 : f32
    %91 = vector.broadcast %cst_23 : f32 to vector<2x3xf32>
    %92 = arith.maximumf %90, %91 : vector<2x3xf32>
    %cst_24 = arith.constant 1.000000e+00 : f32
    %93 = vector.broadcast %cst_24 : f32 to vector<2x3xf32>
    %94 = arith.subf %93, %89 : vector<2x3xf32>
    %95 = math.log %94 : vector<2x3xf32>
    %cst_25 = arith.constant -1.000000e+02 : f32
    %96 = vector.broadcast %cst_25 : f32 to vector<2x3xf32>
    %97 = arith.maximumf %95, %96 : vector<2x3xf32>
    %98 = arith.mulf %87, %92 : vector<2x3xf32>
    %cst_26 = arith.constant 1.000000e+00 : f32
    %99 = vector.broadcast %cst_26 : f32 to vector<2x3xf32>
    %100 = arith.subf %99, %87 : vector<2x3xf32>
    %101 = arith.mulf %100, %97 : vector<2x3xf32>
    %102 = arith.addf %98, %101 : vector<2x3xf32>
    %cst_27 = arith.constant 0.000000e+00 : f32
    %103 = vector.broadcast %cst_27 : f32 to vector<2x3xf32>
    %104 = arith.subf %103, %102 : vector<2x3xf32>
    %105 = vector.extract_strided_slice %15 {offsets = [0, 14], sizes = [2, 4], strides = [1, 1]} : vector<2x29xf32> to vector<2x4xf32>
    %106 = vector.extract_strided_slice %11 {offsets = [0, 11], sizes = [2, 4], strides = [1, 1]} : vector<2x23xf32> to vector<2x4xf32>
    %107 = vector.extract_strided_slice %15 {offsets = [0, 18], sizes = [2, 1], strides = [1, 1]} : vector<2x29xf32> to vector<2x1xf32>
    %cst_28 = arith.constant 1.000000e+00 : f32
    %108 = vector.broadcast %cst_28 : f32 to vector<2x1xf32>
    %109 = arith.subf %108, %107 : vector<2x1xf32>
    %110 = vector.broadcast %109 : vector<2x1xf32> to vector<2x4xf32>
    %111 = arith.mulf %105, %110 : vector<2x4xf32>
    %112 = vector.broadcast %109 : vector<2x1xf32> to vector<2x4xf32>
    %113 = arith.mulf %106, %112 : vector<2x4xf32>
    %114 = math.log %113 : vector<2x4xf32>
    %cst_29 = arith.constant -1.000000e+02 : f32
    %115 = vector.broadcast %cst_29 : f32 to vector<2x4xf32>
    %116 = arith.maximumf %114, %115 : vector<2x4xf32>
    %cst_30 = arith.constant 1.000000e+00 : f32
    %117 = vector.broadcast %cst_30 : f32 to vector<2x4xf32>
    %118 = arith.subf %117, %113 : vector<2x4xf32>
    %119 = math.log %118 : vector<2x4xf32>
    %cst_31 = arith.constant -1.000000e+02 : f32
    %120 = vector.broadcast %cst_31 : f32 to vector<2x4xf32>
    %121 = arith.maximumf %119, %120 : vector<2x4xf32>
    %122 = arith.mulf %111, %116 : vector<2x4xf32>
    %cst_32 = arith.constant 1.000000e+00 : f32
    %123 = vector.broadcast %cst_32 : f32 to vector<2x4xf32>
    %124 = arith.subf %123, %111 : vector<2x4xf32>
    %125 = arith.mulf %124, %121 : vector<2x4xf32>
    %126 = arith.addf %122, %125 : vector<2x4xf32>
    %cst_33 = arith.constant 0.000000e+00 : f32
    %127 = vector.broadcast %cst_33 : f32 to vector<2x4xf32>
    %128 = arith.subf %127, %126 : vector<2x4xf32>
    %129 = vector.extract_strided_slice %15 {offsets = [0, 19], sizes = [2, 3], strides = [1, 1]} : vector<2x29xf32> to vector<2x3xf32>
    %130 = vector.extract_strided_slice %11 {offsets = [0, 15], sizes = [2, 3], strides = [1, 1]} : vector<2x23xf32> to vector<2x3xf32>
    %131 = vector.extract_strided_slice %15 {offsets = [0, 22], sizes = [2, 1], strides = [1, 1]} : vector<2x29xf32> to vector<2x1xf32>
    %cst_34 = arith.constant 1.000000e+00 : f32
    %132 = vector.broadcast %cst_34 : f32 to vector<2x1xf32>
    %133 = arith.subf %132, %131 : vector<2x1xf32>
    %134 = vector.broadcast %133 : vector<2x1xf32> to vector<2x3xf32>
    %135 = arith.mulf %129, %134 : vector<2x3xf32>
    %136 = vector.broadcast %133 : vector<2x1xf32> to vector<2x3xf32>
    %137 = arith.mulf %130, %136 : vector<2x3xf32>
    %138 = math.log %137 : vector<2x3xf32>
    %cst_35 = arith.constant -1.000000e+02 : f32
    %139 = vector.broadcast %cst_35 : f32 to vector<2x3xf32>
    %140 = arith.maximumf %138, %139 : vector<2x3xf32>
    %cst_36 = arith.constant 1.000000e+00 : f32
    %141 = vector.broadcast %cst_36 : f32 to vector<2x3xf32>
    %142 = arith.subf %141, %137 : vector<2x3xf32>
    %143 = math.log %142 : vector<2x3xf32>
    %cst_37 = arith.constant -1.000000e+02 : f32
    %144 = vector.broadcast %cst_37 : f32 to vector<2x3xf32>
    %145 = arith.maximumf %143, %144 : vector<2x3xf32>
    %146 = arith.mulf %135, %140 : vector<2x3xf32>
    %cst_38 = arith.constant 1.000000e+00 : f32
    %147 = vector.broadcast %cst_38 : f32 to vector<2x3xf32>
    %148 = arith.subf %147, %135 : vector<2x3xf32>
    %149 = arith.mulf %148, %145 : vector<2x3xf32>
    %150 = arith.addf %146, %149 : vector<2x3xf32>
    %cst_39 = arith.constant 0.000000e+00 : f32
    %151 = vector.broadcast %cst_39 : f32 to vector<2x3xf32>
    %152 = arith.subf %151, %150 : vector<2x3xf32>
    %153 = vector.extract_strided_slice %15 {offsets = [0, 23], sizes = [2, 4], strides = [1, 1]} : vector<2x29xf32> to vector<2x4xf32>
    %154 = vector.extract_strided_slice %11 {offsets = [0, 18], sizes = [2, 4], strides = [1, 1]} : vector<2x23xf32> to vector<2x4xf32>
    %155 = vector.extract_strided_slice %15 {offsets = [0, 27], sizes = [2, 1], strides = [1, 1]} : vector<2x29xf32> to vector<2x1xf32>
    %cst_40 = arith.constant 1.000000e+00 : f32
    %156 = vector.broadcast %cst_40 : f32 to vector<2x1xf32>
    %157 = arith.subf %156, %155 : vector<2x1xf32>
    %158 = vector.broadcast %157 : vector<2x1xf32> to vector<2x4xf32>
    %159 = arith.mulf %153, %158 : vector<2x4xf32>
    %160 = vector.broadcast %157 : vector<2x1xf32> to vector<2x4xf32>
    %161 = arith.mulf %154, %160 : vector<2x4xf32>
    %162 = math.log %161 : vector<2x4xf32>
    %cst_41 = arith.constant -1.000000e+02 : f32
    %163 = vector.broadcast %cst_41 : f32 to vector<2x4xf32>
    %164 = arith.maximumf %162, %163 : vector<2x4xf32>
    %cst_42 = arith.constant 1.000000e+00 : f32
    %165 = vector.broadcast %cst_42 : f32 to vector<2x4xf32>
    %166 = arith.subf %165, %161 : vector<2x4xf32>
    %167 = math.log %166 : vector<2x4xf32>
    %cst_43 = arith.constant -1.000000e+02 : f32
    %168 = vector.broadcast %cst_43 : f32 to vector<2x4xf32>
    %169 = arith.maximumf %167, %168 : vector<2x4xf32>
    %170 = arith.mulf %159, %164 : vector<2x4xf32>
    %cst_44 = arith.constant 1.000000e+00 : f32
    %171 = vector.broadcast %cst_44 : f32 to vector<2x4xf32>
    %172 = arith.subf %171, %159 : vector<2x4xf32>
    %173 = arith.mulf %172, %169 : vector<2x4xf32>
    %174 = arith.addf %170, %173 : vector<2x4xf32>
    %cst_45 = arith.constant 0.000000e+00 : f32
    %175 = vector.broadcast %cst_45 : f32 to vector<2x4xf32>
    %176 = arith.subf %175, %174 : vector<2x4xf32>
    %177 = vector.extract_strided_slice %15 {offsets = [0, 28], sizes = [2, 1], strides = [1, 1]} : vector<2x29xf32> to vector<2x1xf32>
    %178 = vector.extract_strided_slice %11 {offsets = [0, 22], sizes = [2, 1], strides = [1, 1]} : vector<2x23xf32> to vector<2x1xf32>
    %179 = math.log %178 : vector<2x1xf32>
    %cst_46 = arith.constant -1.000000e+02 : f32
    %180 = vector.broadcast %cst_46 : f32 to vector<2x1xf32>
    %181 = arith.maximumf %179, %180 : vector<2x1xf32>
    %cst_47 = arith.constant 1.000000e+00 : f32
    %182 = vector.broadcast %cst_47 : f32 to vector<2x1xf32>
    %183 = arith.subf %182, %178 : vector<2x1xf32>
    %184 = math.log %183 : vector<2x1xf32>
    %cst_48 = arith.constant -1.000000e+02 : f32
    %185 = vector.broadcast %cst_48 : f32 to vector<2x1xf32>
    %186 = arith.maximumf %184, %185 : vector<2x1xf32>
    %187 = arith.mulf %177, %181 : vector<2x1xf32>
    %cst_49 = arith.constant 1.000000e+00 : f32
    %188 = vector.broadcast %cst_49 : f32 to vector<2x1xf32>
    %189 = arith.subf %188, %177 : vector<2x1xf32>
    %190 = arith.mulf %189, %186 : vector<2x1xf32>
    %191 = arith.addf %187, %190 : vector<2x1xf32>
    %cst_50 = arith.constant 0.000000e+00 : f32
    %192 = vector.broadcast %cst_50 : f32 to vector<2x1xf32>
    %193 = arith.subf %192, %191 : vector<2x1xf32>
    %194 = tpu.concatenate %39, %63, %80, %104, %128, %152, %176, %193 in 1 : vector<2x3xf32>, vector<2x4xf32>, vector<2x1xf32>, vector<2x3xf32>, vector<2x4xf32>, vector<2x3xf32>, vector<2x4xf32>, vector<2x1xf32> -> vector<2x23xf32>
    %cst_51 = arith.constant dense<0.000000e+00> : vector<23xf32>
    %195 = vector.multi_reduction <add>, %194, %cst_51 [0] : vector<2x23xf32> to vector<23xf32>
    %196 = vector.shape_cast %195 : vector<23xf32> to vector<1x23xf32>
    %cst_52 = arith.constant 0.000000e+00 : f32
    %197 = vector.broadcast %cst_52 : f32 to vector<1x105xf32>
    %198 = tpu.concatenate %196, %197 in 1 : vector<1x23xf32>, vector<1x105xf32> -> vector<1x128xf32>
    %199 = tpu.iota {dimensions = array<i32: 0>} : vector<8x128xi32>
    %c0_i32 = arith.constant 0 : i32
    %200 = vector.broadcast %c0_i32 : i32 to vector<8x128xi32>
    %201 = arith.cmpi eq, %199, %200 : vector<8x128xi32>
    %cst_53 = arith.constant 0.000000e+00 : f32
    %202 = vector.shape_cast %198 : vector<1x128xf32> to vector<1x128xf32>
    %203 = vector.broadcast %202 : vector<1x128xf32> to vector<8x128xf32>
    %204 = vector.broadcast %cst_53 : f32 to vector<8x128xf32>
    %205 = arith.select %201, %203, %204 : vector<8x128xi1>, vector<8x128xf32>
    %c0_54 = arith.constant 0 : index
    %c0_55 = arith.constant 0 : index
    %206 = vector.load %arg3[%c0_54, %c0_55] : memref<8x128xf32, #tpu.memory_space<vmem>>, vector<8x128xf32>
    tpu.vector_store %arg3[%c0_54, %c0_55], %205 {strides = array<i32>} : memref<8x128xf32, #tpu.memory_space<vmem>>, vector<8x128xf32>,
    return
  }
  func.func @transform_0(%arg0: i32) -> (i32, i32) {
    %c0_i32 = arith.constant 0 : i32
    %c0_i32_0 = arith.constant 0 : i32
    return %arg0, %c0_i32 : i32, i32
  }
  func.func @transform_1(%arg0: i32) -> (i32, i32) {
    %c0_i32 = arith.constant 0 : i32
    %c0_i32_0 = arith.constant 0 : i32
    return %arg0, %c0_i32 : i32, i32
  }
  func.func @transform_2(%arg0: i32) -> (i32, i32) {
    %c0_i32 = arith.constant 0 : i32
    %c0_i32_0 = arith.constant 0 : i32
    return %arg0, %c0_i32 : i32, i32
  }
}

</mosaic_0001>

<bundles_post_ra>
// kernel: tpu_custom_call.1
= control target key start
LH: loop header
LB: loop body
LE: loop exit
PB: predicated region body
PF: predicated region fallthrough
CT: control target
= control target key end

     0   :  { %7 = vsyncpa [#allocation3], 0  ;;  %s532_s0 = inlined_call_operand.hbm [shape: f32[2,23], index: 0, kind: input, shape index: {}]   ;;  %s533_s1 = inlined_call_operand.vmem [shape: f32[2,29], index: 1, kind: input, shape index: {}]   ;;  %s534_s2 = inlined_call_operand.hbm [shape: f32[8,128], index: 2, kind: output, shape index: {}]  }
   0x1   :  { %8 = vsyncpa [#allocation4], 0  ;;  %s392_s9 = smov [#allocation2]   ;;  %s344_s13 = scalar_lea.hbm %s532_s0, 32 }
   0x2   :  { %s15_s10 = sshll.u32 %s392_s9, 4  ;;  %p345_p0 = scmp.ne.s32.totalorder %s532_s0, %s344_s13  ;;  %s16_s10 = int_to_ptr.vmem [resolvable:$true] %s15_s10 }
   0x3   :  { %p348_p1 = scmp.lt.u32.totalorder %s344_s13, %s532_s0 }
   0x5   :  { %p350_p2 = pnand %p348_p1, %p345_p0 }
   0x7   :  { %353 = shalt.err (!%p350_p2)
}
   0x8   :  { %s354_s18 = scalar_lea.vmem %s16_s10, 32  ;;  %p359_p4 = scmp.lt.s32.totalorder %s16_s10, %s16_s10 }
   0x9   :  { %p355_p3 = scmp.ne.s32.totalorder %s16_s10, %s354_s18  ;;  %p360_p5 = scmp.lt.s32.totalorder %s354_s18, %s354_s18 }
   0xb   :  { %p361_p6 = por %p360_p5, %p359_p4 }
   0xd   :  { %p362_p7 = pnand %p361_p6, %p355_p3 }
   0xf   :  { %365 = shalt.err (!%p362_p7)
}
  0x10   :  { %18 = dma.hbm_to_vmem [thread:$0]  %s532_s0, 32, %s16_s10, [#allocation3]  }
  0x11   :  { %388 = dma.done.wait [#allocation3], 32  }
  0x12   :  { %389 = vsyncadd [#allocation3], 4294967264  ;;  %v27_v0 = vlaneseq  ;;  %v393_v1 = vmov 8   ;;  %v394_v2 = vmov 18   ;;  %v25_v4 = vld [vmem:[%s533_s1] sm:$0x3] }
  0x13   :  { %309 = vset.pattern.permute.xlu0 %v393_v1  ;;  %311 = vset.pattern.permute.xlu1 %v394_v2  ;;  %v24_v5 = vld [vmem:[#allocation2] sm:$0x3]  ;;  %v395_v10 = vmov 13   ;;  %v396_v11 = vmov 22   ;;  %v397_v13 = vmov 27   ;;  %s398_s0 = smov 2  }
  0x14   :  { %v439_v3 = vshrl.u32 %v27_v0, 7  ;;  %v399_v19 = vmov 3   ;;  %s400_s1 = smov 1   ;;  %s401_s23 = smov 3   ;;  %vm243_vm1 = vcmask 23552   ;;  %vm245_vm2 = vcmask 56320  }
  0x15   :  { %s402_s24 = smov 4   ;;  %s403_s25 = smov 5   ;;  %vm247_vm3 = vcmask 64512   ;;  %vm249_vm4 = vcmask 89088   ;;  %vm251_vm5 = vcmask 121856   ;;  %vm253_vm6 = vcmask 146432  }
  0x16   :  { %vm31_vm0 = vcmp.lt.s32.totalorder %v439_v3, 2  ;;  %s404_s26 = smov 6   ;;  %s405_s27 = smov 126   ;;  %vm255_vm7 = vcmask 179200   ;;  %vm257_vm8 = vcmask 181248   ;;  %vm265_vm9 = vcmask 187392  }
  0x17   :  { %v445_v6 = vsel %vm31_vm0, %v25_v4, 1.0  ;;  %v447_v7 = vsel %vm31_vm0, %v24_v5, 1.0  ;;  %s406_s28 = smov 127   ;;  %s407_s29 = smov 125   ;;  %vm267_vm10 = vcmp.eq.s32.totalorder %v439_v3, 0 }
  0x18   :  { %v450_v8 = vsub.f32 1.0, %v445_v6  ;;  %316 = vlog2.f32 %v447_v7  ;;  %v85_v9 = vsub.f32 1.0, %v447_v7  ;;  %s408_s30 = smov 124   ;;  %s409_s3 = smov 123  }
  0x19   :  { %s410_s4 = smov 122   ;;  %s411_s5 = smov [#allocation5]  }
  0x1a   :  { %57 = vperm.xlu0 %309, %v450_v8   ;;  %128 = vperm.xlu1 %311, %v450_v8   ;;  %318 = vlog2.f32 %v85_v9  ;;  %s280_s6 = sshll.u32 %s411_s5, 4  ;;  %s281_s6 = int_to_ptr.vmem [resolvable:$true] %s280_s6 }
  0x1b   :  { %s366_s7 = scalar_lea.vmem %s281_s6, 128  ;;  %p371_p9 = scmp.lt.s32.totalorder %s281_s6, %s281_s6 }
  0x1c   :  { %p367_p8 = scmp.ne.s32.totalorder %s281_s6, %s366_s7  ;;  %p372_p10 = scmp.lt.s32.totalorder %s366_s7, %s366_s7 }
  0x1e   :  { %310 = vset.pattern.permute.xlu0 %v395_v10  ;;  %312 = vset.pattern.permute.xlu1 %v396_v11  ;;  %p373_p11 = por %p372_p10, %p371_p9 }
  0x1f   :  { %102 = vperm.xlu0 %310, %v450_v8   ;;  %154 = vperm.xlu1 %312, %v450_v8  }
  0x20   :  { %p374_p12 = pnand %p373_p11, %p367_p8 }
  0x22   :  { %v317_v12 = vpop.eup %316 }
  0x23   :  { %313 = vset.pattern.permute.xlu1 %v397_v13  ;;  %v459_v14 = vmul.f32 0.6931472, %v317_v12  ;;  %314 = vset.pattern.permute.xlu0 %v399_v19 }
  0x24   :  { %v319_v15 = vpop.eup %318  ;;  %180 = vperm.xlu1 %313, %v450_v8  }
  0x25   :  { %v84_v16 = vmax.f32 %v459_v14, -100.0  ;;  %v463_v17 = vmul.f32 0.6931472, %v319_v15 }
  0x27   :  { %90 = vrot.lane.b32.xlu0 %v84_v16, %s398_s0  ;;  %v88_v18 = vmax.f32 %v463_v17, -100.0 }
  0x29   :  { %95 = vrot.lane.b32.xlu1 %v88_v18, %s398_s0 }
  0x99   :  { %v472_v20 = vpop.permute.xlu0 %57  ;;  %v474_v21 = vpop.permute.xlu1 %128 }
  0x9a   :  { %v61_v22 = vmul.f32 %v472_v20, %v447_v7  ;;  %v132_v23 = vmul.f32 %v474_v21, %v447_v7  ;;  %v60_v11 = vmul.f32 %v472_v20, %v445_v6 }
  0x9c   :  { %320 = vlog2.f32 %v61_v22  ;;  %v65_v24 = vsub.f32 1.0, %v61_v22  ;;  %v136_v25 = vsub.f32 1.0, %v132_v23  ;;  %v74_v15 = vsub.f32 1.0, %v60_v11 }
  0x9e   :  { %322 = vlog2.f32 %v65_v24  ;;  %v480_v26 = vpop.permute.xlu0 %102  ;;  %v482_v27 = vpop.permute.xlu1 %154 }
  0x9f   :  { %v106_v28 = vmul.f32 %v480_v26, %v447_v7  ;;  %324 = vlog2.f32 %v132_v23  ;;  %v158_v29 = vmul.f32 %v482_v27, %v447_v7  ;;  %v105_v14 = vmul.f32 %v480_v26, %v445_v6 }
  0xa0   :  { %326 = vlog2.f32 %v136_v25  ;;  %v131_v23 = vmul.f32 %v474_v21, %v445_v6 }
  0xa1   :  { %328 = vlog2.f32 %v106_v28  ;;  %v110_v30 = vsub.f32 1.0, %v106_v28  ;;  %v162_v31 = vsub.f32 1.0, %v158_v29  ;;  %v119_v24 = vsub.f32 1.0, %v105_v14 }
  0xa2   :  { %330 = vlog2.f32 %v158_v29  ;;  %v91_v1 = vpop.permute.xlu0 %90 }
  0xa3   :  { %332 = vlog2.f32 %v110_v30  ;;  %v488_v32 = vpop.permute.xlu1 %180  ;;  %v93_v4 = vmul.f32 %v91_v1, %v445_v6  ;;  %v157_v30 = vmul.f32 %v482_v27, %v445_v6 }
  0xa4   :  { %v184_v33 = vmul.f32 %v488_v32, %v447_v7  ;;  %334 = vlog2.f32 %v162_v31  ;;  %v145_v31 = vsub.f32 1.0, %v131_v23  ;;  %v183_v21 = vmul.f32 %v488_v32, %v445_v6 }
  0xa6   :  { %v321_v34 = vpop.eup %320  ;;  %v188_v35 = vsub.f32 1.0, %v184_v33  ;;  %336 = vlog2.f32 %v184_v33 }
  0xa7   :  { %v63_v36 = vmul.f32 0.6931472, %v321_v34  ;;  %v96_v63 = vpop.permute.xlu1 %95 }
  0xa8   :  { %v323_v37 = vpop.eup %322  ;;  %338 = vlog2.f32 %v188_v35  ;;  %v98_v5 = vmul.f32 %v96_v63, %v450_v8 }
  0xa9   :  { %v325_v38 = vpop.eup %324  ;;  %v64_v39 = vmax.f32 %v63_v36, -100.0  ;;  %v67_v40 = vmul.f32 0.6931472, %v323_v37 }
  0xaa   :  { %v327_v41 = vpop.eup %326  ;;  %v134_v49 = vmul.f32 0.6931472, %v325_v38  ;;  %v99_v9 = vadd.f32 %v98_v5, %v93_v4 }
  0xab   :  { %v329_v42 = vpop.eup %328  ;;  %70 = vrot.lane.b32.xlu0 %v64_v39, %s400_s1  ;;  %v68_v43 = vmax.f32 %v67_v40, -100.0  ;;  %v138_v52 = vmul.f32 0.6931472, %v327_v41  ;;  %v171_v39 = vsub.f32 1.0, %v157_v30 }
  0xac   :  { %v331_v44 = vpop.eup %330  ;;  %v108_v45 = vmul.f32 0.6931472, %v329_v42  ;;  %v135_v55 = vmax.f32 %v134_v49, -100.0  ;;  %v100_v10 = vsub.f32 0.0, %v99_v9 }
  0xad   :  { %v333_v46 = vpop.eup %332  ;;  %76 = vrot.lane.b32.xlu1 %v68_v43, %s400_s1  ;;  %v160_v53 = vmul.f32 0.6931472, %v331_v44  ;;  %v139_v58 = vmax.f32 %v138_v52, -100.0 }
  0xae   :  { %v109_v47 = vmax.f32 %v108_v45, -100.0  ;;  %v112_v48 = vmul.f32 0.6931472, %v333_v46  ;;  %v335_v50 = vpop.eup %334  ;;  %v197_v45 = vsub.f32 1.0, %v183_v21 }
  0xaf   :  { %v164_v56 = vmul.f32 0.6931472, %v335_v50  ;;  %v161_v59 = vmax.f32 %v160_v53, -100.0 }
  0xb0   :  { %115 = vrot.lane.b32.xlu0 %v109_v47, %s398_s0  ;;  %v113_v51 = vmax.f32 %v112_v48, -100.0  ;;  %v337_v54 = vpop.eup %336 }
  0xb1   :  { %v186_v60 = vmul.f32 0.6931472, %v337_v54  ;;  %v165_v61 = vmax.f32 %v164_v56, -100.0 }
  0xb2   :  { %121 = vrot.lane.b32.xlu1 %v113_v51, %s398_s0  ;;  %v339_v57 = vpop.eup %338 }
  0xb3   :  { %v190_v62 = vmul.f32 0.6931472, %v339_v57  ;;  %v187_v0 = vmax.f32 %v186_v60, -100.0 }
  0xb4   :  { %141 = vrot.lane.b32.xlu0 %v135_v55, %s401_s23 }
  0xb5   :  { %v191_v2 = vmax.f32 %v190_v62, -100.0 }
  0xb6   :  { %147 = vrot.lane.b32.xlu1 %v139_v58, %s401_s23 }
  0xb8   :  { %167 = vrot.lane.b32.xlu0 %v161_v59, %s402_s24 }
  0xba   :  { %173 = vrot.lane.b32.xlu1 %v165_v61, %s402_s24 }
  0xbc   :  { %193 = vrot.lane.b32.xlu0 %v187_v0, %s403_s25 }
  0xbe   :  { %199 = vrot.lane.b32.xlu1 %v191_v2, %s403_s25 }
  0xc0   :  { %205 = vrot.lane.b32.xlu0 %v84_v16, %s404_s26 }
  0xc2   :  { %209 = vrot.lane.b32.xlu1 %v88_v18, %s404_s26 }
  0xc4   :  { %39 = vperm.xlu0 %314, %v450_v8  }
  0xc6   :  { %220 = vrot.lane.b32.xlu1 %v100_v10, %s405_s27 }
  0xc8   :  { %315 = vset.pattern.permute.xlu0 %v397_v13 }
 0x11d   :  { %v71_v12 = vpop.permute.xlu0 %70 }
 0x11e   :  { %v73_v19 = vmul.f32 %v71_v12, %v60_v11 }
 0x11f   :  { %v77_v16 = vpop.permute.xlu1 %76 }
 0x120   :  { %v79_v17 = vmul.f32 %v77_v16, %v74_v15 }
 0x122   :  { %v80_v18 = vadd.f32 %v79_v17, %v73_v19  ;;  %v116_v22 = vpop.permute.xlu0 %115 }
 0x123   :  { %v118_v13 = vmul.f32 %v116_v22, %v105_v14 }
 0x124   :  { %v81_v25 = vsub.f32 0.0, %v80_v18  ;;  %v122_v28 = vpop.permute.xlu1 %121 }
 0x125   :  { %v124_v29 = vmul.f32 %v122_v28, %v119_v24 }
 0x126   :  { %216 = vrot.lane.b32.xlu1 %v81_v25, %s406_s28  ;;  %v142_v20 = vpop.permute.xlu0 %141 }
 0x127   :  { %v125_v26 = vadd.f32 %v124_v29, %v118_v13  ;;  %v144_v35 = vmul.f32 %v142_v20, %v131_v23 }
 0x128   :  { %v148_v33 = vpop.permute.xlu1 %147 }
 0x129   :  { %v126_v34 = vsub.f32 0.0, %v125_v26  ;;  %v150_v36 = vmul.f32 %v148_v33, %v145_v31  ;;  %v270_v31 = vsub.s32 0, %v439_v3 }
 0x12a   :  { %v168_v37 = vpop.permute.xlu0 %167 }
 0x12b   :  { %v151_v38 = vadd.f32 %v150_v36, %v144_v35  ;;  %224 = vrot.lane.b32.xlu0 %v126_v34, %s405_s27  ;;  %v170_v42 = vmul.f32 %v168_v37, %v157_v30 }
 0x12c   :  { %v174_v40 = vpop.permute.xlu1 %173 }
 0x12d   :  { %v152_v41 = vsub.f32 0.0, %v151_v38  ;;  %v176_v43 = vmul.f32 %v174_v40, %v171_v39 }
 0x12e   :  { %v194_v44 = vpop.permute.xlu0 %193 }
 0x12f   :  { %v177_v27 = vadd.f32 %v176_v43, %v170_v42  ;;  %228 = vrot.lane.b32.xlu1 %v152_v41, %s407_s29  ;;  %v196_v48 = vmul.f32 %v194_v44, %v183_v21 }
 0x130   :  { %v200_v46 = vpop.permute.xlu1 %199 }
 0x131   :  { %v178_v47 = vsub.f32 0.0, %v177_v27  ;;  %v202_v49 = vmul.f32 %v200_v46, %v197_v45 }
 0x132   :  { %v206_v50 = vpop.permute.xlu0 %205 }
 0x133   :  { %v203_v51 = vadd.f32 %v202_v49, %v196_v48  ;;  %232 = vrot.lane.b32.xlu0 %v178_v47, %s408_s30  ;;  %v208_v32 = vmul.f32 %v206_v50, %v445_v6 }
 0x134   :  { %v210_v52 = vpop.permute.xlu1 %209 }
 0x135   :  { %v204_v53 = vsub.f32 0.0, %v203_v51  ;;  %v212_v54 = vmul.f32 %v210_v52, %v450_v8 }
 0x137   :  { %v213_v55 = vadd.f32 %v212_v54, %v208_v32  ;;  %236 = vrot.lane.b32.xlu1 %v204_v53, %s409_s3 }
 0x138   :  { %v221_v9 = vpop.permute.xlu1 %220 }
 0x139   :  { %v214_v56 = vsub.f32 0.0, %v213_v55 }
 0x13b   :  { %240 = vrot.lane.b32.xlu0 %v214_v56, %s410_s4 }
 0x143   :  { %v40_v57 = vpop.permute.xlu0 %39 }
 0x144   :  { %v43_v58 = vmul.f32 %v40_v57, %v447_v7  ;;  %v42_v62 = vmul.f32 %v40_v57, %v445_v6 }
 0x146   :  { %v47_v59 = vsub.f32 1.0, %v43_v58  ;;  %340 = vlog2.f32 %v43_v58  ;;  %v52_v2 = vsub.f32 1.0, %v42_v62 }
 0x148   :  { %342 = vlog2.f32 %v47_v59 }
 0x150   :  { %v341_v60 = vpop.eup %340 }
 0x151   :  { %v45_v63 = vmul.f32 0.6931472, %v341_v60 }
 0x152   :  { %v343_v61 = vpop.eup %342 }
 0x153   :  { %v49_v0 = vmul.f32 0.6931472, %v343_v61  ;;  %v46_v1 = vmax.f32 %v45_v63, -100.0 }
 0x155   :  { %v50_v8 = vmax.f32 %v49_v0, -100.0  ;;  %v51_v4 = vmul.f32 %v46_v1, %v42_v62 }
 0x157   :  { %v53_v5 = vmul.f32 %v52_v2, %v50_v8 }
 0x159   :  { %v54_v10 = vadd.f32 %v53_v5, %v51_v4 }
 0x15b   :  { %v55_v12 = vsub.f32 0.0, %v54_v10 }
 0x198   :  { %v217_v11 = vpop.permute.xlu1 %216 }
 0x199   :  { %v244_v15 = vsel %vm243_vm1, %v55_v12, %v217_v11 }
 0x19a   :  { %v246_v16 = vsel %vm245_vm2, %v244_v15, %v221_v9 }
 0x19d   :  { %v225_v7 = vpop.permute.xlu0 %224 }
 0x19e   :  { %v248_v19 = vsel %vm247_vm3, %v246_v16, %v225_v7 }
 0x1a1   :  { %v229_v14 = vpop.permute.xlu1 %228 }
 0x1a2   :  { %v250_v18 = vsel %vm249_vm4, %v248_v19, %v229_v14 }
 0x1a5   :  { %v233_v6 = vpop.permute.xlu0 %232 }
 0x1a6   :  { %v252_v22 = vsel %vm251_vm5, %v250_v18, %v233_v6 }
 0x1a9   :  { %v237_v17 = vpop.permute.xlu1 %236 }
 0x1aa   :  { %v254_v23 = vsel %vm253_vm6, %v252_v22, %v237_v17 }
 0x1ad   :  { %v241_v24 = vpop.permute.xlu0 %240 }
 0x1ae   :  { %v256_v25 = vsel %vm255_vm7, %v254_v23, %v241_v24 }
 0x1af   :  { %v258_v28 = vsel %vm257_vm8, %v256_v25, 0.0 }
 0x1b0   :  { %v259_v13 = vrot.slane %v258_v28, 4 }
 0x1b2   :  { %v260_v29 = vadd.f32 %v259_v13, %v258_v28 }
 0x1b4   :  { %v261_v20 = vrot.slane %v260_v29, 2 }
 0x1b6   :  { %v262_v30 = vadd.f32 %v261_v20, %v260_v29 }
 0x1b8   :  { %v263_v26 = vrot.slane %v262_v30, 1 }
 0x1ba   :  { %v264_v33 = vadd.f32 %v263_v26, %v262_v30 }
 0x1bc   :  { %v266_v34 = vsel %vm265_vm9, %v264_v33, 0.0 }
 0x1bd   :  { %v271_v35 = vrot.slane %v266_v34, %v270_v31 }
 0x1bf   :  { %v272_v36 = vsel %vm267_vm10, %v271_v35, 0.0 }
 0x1c0   :  { %273 = vst [vmem:[#allocation5] sm:$0xff] %v272_v36 }
 0x1c1   :  { %377 = shalt.err (!%p374_p12)
}
 0x1c2   :  { %s378_s10 = scalar_lea.hbm %s534_s2, 128 }
 0x1c3   :  { %p379_p13 = scmp.ne.s32.totalorder %s534_s2, %s378_s10  ;;  %p382_p0 = scmp.lt.u32.totalorder %s378_s10, %s534_s2 }
 0x1c5   :  { %p384_p1 = pnand %p382_p0, %p379_p13 }
 0x1c7   :  { %387 = shalt.err (!%p384_p1)
}
 0x1c8   :  { %283 = dma.vmem_to_hbm [thread:$0]  %s281_s6, 128, %s534_s2, [#allocation4]  }
 0x1c9   :  { %390 = dma.done.wait [#allocation4], 128  }
 0x1ca   :  { %391 = vsyncadd [#allocation4], 4294967168 }
 0x1cb   :  { %287 = vsyncpa [#allocation3], 1 }
 0x1cc   :  { %288 = vsyncpa [#allocation4], 1 }

</bundles_post_ra>
